<compile_context>
chip_gen: v6e
topology: v6e:2x2x1
jax: 0.10.0
libtpu: 0.0.40
codegen_flags: <defaults>
</compile_context>

<pallas_src>
import functools

import jax
import jax.numpy as jnp
from jax.experimental import pallas as pl
from jax.experimental.pallas import tpu as pltpu

LN_EPS = 1e-5


def _round_up(n, m):
    return (n + m - 1) // m * m


# ---------------------------------------------------------------------------
# Generation-aware defaults (tile size, VMEM capacity, TensorCores per chip).
# ---------------------------------------------------------------------------
def _tpu_defaults():
    kind = ""
    try:
        kind = jax.devices()[0].device_kind.lower()
    except Exception:
        pass
    is_v5e = ("v5e" in kind) or ("v5 lite" in kind) or ("v5lite" in kind)
    is_v7 = ("v7" in kind) or ("tpu7" in kind)

    vmem_cap = None
    try:
        vmem_cap = int(pltpu.get_tpu_info().vmem_capacity_bytes)
    except Exception:
        vmem_cap = None
    if not vmem_cap or vmem_cap <= 0:
        vmem_cap = (64 << 20) if is_v7 else (128 << 20)

    default_tile_b = 128 if is_v5e else 256   # v5e: 4x128 MXU + single vst slot
    num_cores = 2 if is_v7 else 1             # v7x: 2 TensorCores per chip
    return default_tile_b, vmem_cap, num_cores


# ---------------------------------------------------------------------------
# Kernel
# ---------------------------------------------------------------------------
def residual_mlp_kernel(inv_d_out, n_pad, x_ref, w1_ref, w2_ref, w3_ref,
                        vec_ref, o_ref):
    """One batch tile: fc1 -> fc2+relu -> fc3+relu -> +residual -> LayerNorm."""
    x = x_ref[...]                       # (tile_b, D_in_p) bf16
    b1 = vec_ref[0:1, :]                 # rows of the packed (8, D_p) f32 block
    b2 = vec_ref[1:2, :]
    b3 = vec_ref[2:3, :]
    gamma = vec_ref[3:4, :]
    beta = vec_ref[4:5, :]

    # fc1: bf16 MXU operands, f32 accumulation.
    h1 = jnp.dot(x, w1_ref[...], preferred_element_type=jnp.float32) + b1
    # fc2 + relu
    h2 = jnp.dot(h1.astype(jnp.bfloat16), w2_ref[...],
                 preferred_element_type=jnp.float32) + b2
    h2 = jnp.maximum(h2, 0.0)
    # fc3 + relu
    h3 = jnp.dot(h2.astype(jnp.bfloat16), w3_ref[...],
                 preferred_element_type=jnp.float32) + b3
    h3 = jnp.maximum(h3, 0.0)

    # Residual add + LayerNorm in f32 (two-pass variance for stability).
    # Padded lanes of y are exactly zero (zero-padded weight cols / biases),
    # so the sum only sees real features; mask the centered value so padding
    # does not leak into the variance, and divide by the real feature count.
    y = h3 + h1
    mean = jnp.sum(y, axis=-1, keepdims=True) * inv_d_out
    yc = y - mean
    if n_pad:  # static
        d_p = y.shape[-1]
        lane = jax.lax.broadcasted_iota(jnp.int32, (1, d_p), 1)
        yc = jnp.where(lane < (d_p - n_pad), yc, 0.0)
    var = jnp.sum(yc * yc, axis=-1, keepdims=True) * inv_d_out
    y_norm = yc * jax.lax.rsqrt(var + LN_EPS)
    o_ref[...] = (y_norm * gamma + beta).astype(o_ref.dtype)


# ---------------------------------------------------------------------------
# One-time weight preparation (do NOT call per forward).
# ---------------------------------------------------------------------------
def prepare_params(params):
    """Pad feature dims to multiples of 128, cast MXU operands to bf16, and
    pack b1/b2/b3/gamma/beta into a single (8, D_p) f32 block."""
    d_in, d_out = params["w1"].shape
    d_in_p = _round_up(d_in, 128)
    d_p = _round_up(d_out, 128)

    w1 = jnp.pad(params["w1"].astype(jnp.bfloat16),
                 ((0, d_in_p - d_in), (0, d_p - d_out)))
    w2 = jnp.pad(params["w2"].astype(jnp.bfloat16),
                 ((0, d_p - d_out), (0, d_p - d_out)))
    w3 = jnp.pad(params["w3"].astype(jnp.bfloat16),
                 ((0, d_p - d_out), (0, d_p - d_out)))

    vec_rows = jnp.stack([
        params["b1"].reshape(-1).astype(jnp.float32),
        params["b2"].reshape(-1).astype(jnp.float32),
        params["b3"].reshape(-1).astype(jnp.float32),
        params["gamma"].reshape(-1).astype(jnp.float32),
        params["beta"].reshape(-1).astype(jnp.float32),
    ])                                                        # (5, d_out)
    vecs = jnp.pad(vec_rows, ((0, 8 - 5), (0, d_p - d_out)))  # (8, d_p)

    return dict(w1=w1, w2=w2, w3=w3, vecs=vecs,
                d_in=d_in, d_out=d_out, d_in_p=d_in_p, d_p=d_p)


# ---------------------------------------------------------------------------
# Wrapper
# ---------------------------------------------------------------------------
def residual_mlp(x, prepped, *, tile_b=None, out_dtype=None, stream_bufs=2,
                 vmem_headroom_bytes=4 << 20):
    """x: (B, input_dim) -> (B, output_dim).

    `prepped` comes from prepare_params().  tile_b defaults to a
    generation-aware value (128 on v5e, else 256), is rounded to a multiple of
    16, and on megacore parts is capped so the batch grid has >= 2 steps.
    """
    B, d_in = x.shape
    assert d_in == prepped["d_in"], "input feature dim mismatch"
    d_out, d_in_p, d_p = prepped["d_out"], prepped["d_in_p"], prepped["d_p"]
    out_dtype = x.dtype if out_dtype is None else out_dtype

    default_tile_b, vmem_cap, num_cores = _tpu_defaults()
    tile_b = default_tile_b if tile_b is None else int(tile_b)
    tile_b = _round_up(max(16, tile_b), 16)                 # bf16 sublane packing
    tile_b = min(tile_b, _round_up(-(-B // num_cores), 16))  # >=2 steps on megacore

    B_p = _round_up(B, tile_b)
    grid_b = B_p // tile_b

    x_p = jnp.pad(x.astype(jnp.bfloat16), ((0, B_p - B), (0, d_in_p - d_in)))

    # Explicit VMEM budget: streaming x/out buffers + single-buffered resident
    # weights + packed vectors + live f32 intermediates, clamped to ~0.85x of
    # the detected per-core VMEM capacity.
    itemsize_out = jnp.dtype(out_dtype).itemsize
    sbuf = max(2, int(stream_bufs))
    vmem_bytes = (
        sbuf * tile_b * d_in_p * 2             # x tiles (bf16, streaming)
        + sbuf * tile_b * d_p * itemsize_out   # out tiles (streaming)
        + d_in_p * d_p * 2                     # w1 (single-buffered, resident)
        + 2 * d_p * d_p * 2                    # w2, w3 (single-buffered)
        + 8 * d_p * 4                          # packed bias/LN block
        + 6 * tile_b * d_p * 4                 # live f32 intermediates
        + vmem_headroom_bytes)
    vmem_bytes = int(max(16 << 20, min(vmem_bytes, int(0.85 * vmem_cap))))
    # TODO(synk): if the working set still exceeds the clamp (very large d_out
    # on v7x), switch to a feature-tiled grid with K-accumulation for w2/w3.

    kernel = functools.partial(residual_mlp_kernel,
                               1.0 / float(d_out), d_p - d_out)
    operands = (x_p, prepped["w1"], prepped["w2"], prepped["w3"], prepped["vecs"])

    def build(use_buffered):
        def spec(shape, index_map, bufs):
            if use_buffered and bufs is not None:
                return pl.BlockSpec(shape, index_map,
                                    pipeline_mode=pl.Buffered(bufs))
            return pl.BlockSpec(shape, index_map)

        stream = int(stream_bufs) if int(stream_bufs) != 2 else None
        return pl.pallas_call(
            kernel,
            out_shape=jax.ShapeDtypeStruct((B_p, d_p), out_dtype),
            grid_spec=pltpu.PrefetchScalarGridSpec(
                num_scalar_prefetch=0,
                grid=(grid_b,),
                in_specs=[
                    spec((tile_b, d_in_p), lambda i: (i, 0), stream),  # x (stream)
                    spec((d_in_p, d_p), lambda i: (0, 0), 1),          # w1 (const)
                    spec((d_p, d_p), lambda i: (0, 0), 1),             # w2 (const)
                    spec((d_p, d_p), lambda i: (0, 0), 1),             # w3 (const)
                    spec((8, d_p), lambda i: (0, 0), 1),               # b/gamma/beta
                ],
                out_specs=spec((tile_b, d_p), lambda i: (i, 0), stream),
            ),
            compiler_params=pltpu.CompilerParams(
                dimension_semantics=("parallel",),
                vmem_limit_bytes=vmem_bytes),
        )

    use_buffered = hasattr(pl, "Buffered")
    try:
        out_p = build(use_buffered)(*operands)
    except Exception:
        if not use_buffered:
            raise
        # Fallback for jax versions without BlockSpec pipeline_mode support.
        out_p = build(False)(*operands)

    return out_p[:B, :d_out]


# ---------------------------------------------------------------------------
# Params init + pure-JAX reference
# ---------------------------------------------------------------------------
def init_params(key, input_dim, output_dim, dtype=jnp.float32):
    """Deterministic synthetic init (PyTorch-Linear-like uniform fan-in bounds)."""
    ks = jax.random.split(key, 6)

    def linear(kw, kb, d_in, d_out):
        bound = 1.0 / (d_in ** 0.5)
        # Stored as (in, out) == PyTorch weight.T so the kernel computes x @ W + b.
        w = jax.random.uniform(kw, (d_in, d_out), dtype, -bound, bound)
        b = jax.random.uniform(kb, (d_out,), dtype, -bound, bound)
        return w, b

    w1, b1 = linear(ks[0], ks[1], input_dim, output_dim)
    w2, b2 = linear(ks[2], ks[3], output_dim, output_dim)
    w3, b3 = linear(ks[4], ks[5], output_dim, output_dim)
    gamma = jnp.ones((output_dim,), dtype)
    beta = jnp.zeros((output_dim,), dtype)
    return dict(w1=w1, b1=b1, w2=w2, b2=b2, w3=w3, b3=b3, gamma=gamma, beta=beta)


def residual_mlp_ref(x, p, *, mirror_bf16=False):
    """Pure-JAX reference.  mirror_bf16=True rounds matmul operands to bf16
    exactly like the kernel (structural check); False is full-f32 math."""
    if mirror_bf16:
        q = lambda a: a.astype(jnp.bfloat16).astype(jnp.float32)
    else:
        q = lambda a: a.astype(jnp.float32)
    h1 = q(x) @ q(p["w1"]) + p["b1"]
    h2 = jnp.maximum(q(h1) @ q(p["w2"]) + p["b2"], 0.0)
    h3 = jnp.maximum(q(h2) @ q(p["w3"]) + p["b3"], 0.0)
    y = h3 + h1
    mean = jnp.mean(y, axis=-1, keepdims=True)
    var = jnp.mean((y - mean) ** 2, axis=-1, keepdims=True)
    return (y - mean) / jnp.sqrt(var + LN_EPS) * p["gamma"] + p["beta"]


if __name__ == "__main__":
    key = jax.random.PRNGKey(0)
    k_x, k_p, k_x2 = jax.random.split(key, 3)

    # Small demo shapes consistent with the module: (batch, input_dim) input.
    B, input_dim, output_dim = 16, 48, 32
    x = jax.random.normal(k_x, (B, input_dim), jnp.float32)
    params = init_params(k_p, input_dim, output_dim)
    prepped = prepare_params(params)   # one-time weight prep, reused per call

    out = residual_mlp(x, prepped)
    jax.block_until_ready(out)
    assert out.shape == (B, output_dim)

    # Structural check vs a reference with identical bf16 operand rounding.
    ref_bf = residual_mlp_ref(x, params, mirror_bf16=True)
    assert jnp.allclose(out, ref_bf, atol=1e-2, rtol=1e-2), "mismatch vs bf16-mirrored ref"
    # End-to-end check vs full-f32 math (loose tol: bf16 MXU operands by design).
    ref_f32 = residual_mlp_ref(x, params, mirror_bf16=False)
    assert jnp.allclose(out, ref_f32, atol=5e-2, rtol=5e-2), "mismatch vs f32 ref"

    # Ragged batch + multi-step grid (exercises batch padding and pipelining).
    B2 = 100
    x2 = jax.random.normal(k_x2, (B2, input_dim), jnp.float32)
    out2 = residual_mlp(x2, prepped, tile_b=32)   # B padded to 128 -> grid of 4
    jax.block_until_ready(out2)
    assert out2.shape == (B2, output_dim)
    ref2 = residual_mlp_ref(x2, params, mirror_bf16=True)
    assert jnp.allclose(out2, ref2, atol=1e-2, rtol=1e-2), "mismatch on ragged batch"

    print("KERNEL_OK")
</pallas_src>

<mosaic_0001>
module attributes {stable_mosaic.version = 11 : i64} {
  func.func @residual_mlp_kernel(%arg0: i32, %arg1: memref<16x128xbf16, #tpu.memory_space<vmem>>, %arg2: memref<128x128xbf16, #tpu.memory_space<vmem>>, %arg3: memref<128x128xbf16, #tpu.memory_space<vmem>>, %arg4: memref<128x128xbf16, #tpu.memory_space<vmem>>, %arg5: memref<8x128xf32, #tpu.memory_space<vmem>>, %arg6: memref<16x128xf32, #tpu.memory_space<vmem>>) attributes {dimension_semantics = [#tpu.dimension_semantics<parallel>], iteration_bounds = array<i64: 1>, scalar_prefetch = 0 : i64, scratch_operands = 0 : i64, tpu.core_type = #tpu.core_type<tc>, window_params = [{transform_indices = @transform_0, window_bounds = array<i64: 16, 128>}, {pipeline_mode = #tpu.pipeline_mode<synchronous>, transform_indices = @transform_1, window_bounds = array<i64: 128, 128>}, {pipeline_mode = #tpu.pipeline_mode<synchronous>, transform_indices = @transform_2, window_bounds = array<i64: 128, 128>}, {pipeline_mode = #tpu.pipeline_mode<synchronous>, transform_indices = @transform_3, window_bounds = array<i64: 128, 128>}, {pipeline_mode = #tpu.pipeline_mode<synchronous>, transform_indices = @transform_4, window_bounds = array<i64: 8, 128>}, {transform_indices = @transform_5, window_bounds = array<i64: 16, 128>}]} {
    %c0 = arith.constant 0 : index
    %c0_0 = arith.constant 0 : index
    %0 = vector.load %arg1[%c0, %c0_0] : memref<16x128xbf16, #tpu.memory_space<vmem>>, vector<16x128xbf16>
    %c0_1 = arith.constant 0 : index
    %c0_2 = arith.constant 0 : index
    %1 = vector.load %arg5[%c0_1, %c0_2] : memref<8x128xf32, #tpu.memory_space<vmem>>, vector<1x128xf32>
    %c1 = arith.constant 1 : index
    %c0_3 = arith.constant 0 : index
    %2 = vector.load %arg5[%c1, %c0_3] : memref<8x128xf32, #tpu.memory_space<vmem>>, vector<1x128xf32>
    %c2 = arith.constant 2 : index
    %c0_4 = arith.constant 0 : index
    %3 = vector.load %arg5[%c2, %c0_4] : memref<8x128xf32, #tpu.memory_space<vmem>>, vector<1x128xf32>
    %c3 = arith.constant 3 : index
    %c0_5 = arith.constant 0 : index
    %4 = vector.load %arg5[%c3, %c0_5] : memref<8x128xf32, #tpu.memory_space<vmem>>, vector<1x128xf32>
    %c4 = arith.constant 4 : index
    %c0_6 = arith.constant 0 : index
    %5 = vector.load %arg5[%c4, %c0_6] : memref<8x128xf32, #tpu.memory_space<vmem>>, vector<1x128xf32>
    %c0_7 = arith.constant 0 : index
    %c0_8 = arith.constant 0 : index
    %6 = vector.load %arg2[%c0_7, %c0_8] : memref<128x128xbf16, #tpu.memory_space<vmem>>, vector<128x128xbf16>
    %cst = arith.constant dense<0.000000e+00> : vector<16x128xf32>
    %7 = tpu.matmul %0, %6, %cst {dimension_numbers = #tpu.dot_dimension_numbers<[1], [0], [0], [1], [0, 0, 1, 1], [], []>} : vector<16x128xbf16>, vector<128x128xbf16>, vector<16x128xf32> -> vector<16x128xf32>
    %8 = vector.broadcast %1 : vector<1x128xf32> to vector<16x128xf32>
    %9 = arith.addf %7, %8 : vector<16x128xf32>
    %10 = arith.truncf %9 : vector<16x128xf32> to vector<16x128xbf16>
    %c0_9 = arith.constant 0 : index
    %c0_10 = arith.constant 0 : index
    %11 = vector.load %arg3[%c0_9, %c0_10] : memref<128x128xbf16, #tpu.memory_space<vmem>>, vector<128x128xbf16>
    %cst_11 = arith.constant dense<0.000000e+00> : vector<16x128xf32>
    %12 = tpu.matmul %10, %11, %cst_11 {dimension_numbers = #tpu.dot_dimension_numbers<[1], [0], [0], [1], [0, 0, 1, 1], [], []>} : vector<16x128xbf16>, vector<128x128xbf16>, vector<16x128xf32> -> vector<16x128xf32>
    %13 = vector.broadcast %2 : vector<1x128xf32> to vector<16x128xf32>
    %14 = arith.addf %12, %13 : vector<16x128xf32>
    %cst_12 = arith.constant 0.000000e+00 : f32
    %15 = vector.broadcast %cst_12 : f32 to vector<16x128xf32>
    %16 = arith.maximumf %14, %15 : vector<16x128xf32>
    %17 = arith.truncf %16 : vector<16x128xf32> to vector<16x128xbf16>
    %c0_13 = arith.constant 0 : index
    %c0_14 = arith.constant 0 : index
    %18 = vector.load %arg4[%c0_13, %c0_14] : memref<128x128xbf16, #tpu.memory_space<vmem>>, vector<128x128xbf16>
    %cst_15 = arith.constant dense<0.000000e+00> : vector<16x128xf32>
    %19 = tpu.matmul %17, %18, %cst_15 {dimension_numbers = #tpu.dot_dimension_numbers<[1], [0], [0], [1], [0, 0, 1, 1], [], []>} : vector<16x128xbf16>, vector<128x128xbf16>, vector<16x128xf32> -> vector<16x128xf32>
    %20 = vector.broadcast %3 : vector<1x128xf32> to vector<16x128xf32>
    %21 = arith.addf %19, %20 : vector<16x128xf32>
    %cst_16 = arith.constant 0.000000e+00 : f32
    %22 = vector.broadcast %cst_16 : f32 to vector<16x128xf32>
    %23 = arith.maximumf %21, %22 : vector<16x128xf32>
    %24 = arith.addf %23, %9 : vector<16x128xf32>
    %cst_17 = arith.constant dense<0.000000e+00> : vector<16xf32>
    %25 = vector.multi_reduction <add>, %24, %cst_17 [1] : vector<16x128xf32> to vector<16xf32>
    %26 = vector.shape_cast %25 : vector<16xf32> to vector<16x1xf32>
    %cst_18 = arith.constant 3.125000e-02 : f32
    %27 = vector.broadcast %cst_18 : f32 to vector<16x1xf32>
    %28 = arith.mulf %26, %27 : vector<16x1xf32>
    %29 = vector.broadcast %28 : vector<16x1xf32> to vector<16x128xf32>
    %30 = arith.subf %24, %29 : vector<16x128xf32>
    %31 = tpu.iota {dimensions = array<i32: 1>} : vector<1x128xi32>
    %c32_i32 = arith.constant 32 : i32
    %32 = vector.broadcast %c32_i32 : i32 to vector<1x128xi32>
    %33 = arith.cmpi slt, %31, %32 : vector<1x128xi32>
    %cst_19 = arith.constant 0.000000e+00 : f32
    %34 = vector.shape_cast %33 : vector<1x128xi1> to vector<1x128xi1>
    %35 = vector.broadcast %34 : vector<1x128xi1> to vector<16x128xi1>
    %36 = vector.broadcast %cst_19 : f32 to vector<16x128xf32>
    %37 = arith.select %35, %30, %36 : vector<16x128xi1>, vector<16x128xf32>
    %38 = arith.mulf %37, %37 : vector<16x128xf32>
    %cst_20 = arith.constant dense<0.000000e+00> : vector<16xf32>
    %39 = vector.multi_reduction <add>, %38, %cst_20 [1] : vector<16x128xf32> to vector<16xf32>
    %40 = vector.shape_cast %39 : vector<16xf32> to vector<16x1xf32>
    %cst_21 = arith.constant 3.125000e-02 : f32
    %41 = vector.broadcast %cst_21 : f32 to vector<16x1xf32>
    %42 = arith.mulf %40, %41 : vector<16x1xf32>
    %cst_22 = arith.constant 9.99999974E-6 : f32
    %43 = vector.broadcast %cst_22 : f32 to vector<16x1xf32>
    %44 = arith.addf %42, %43 : vector<16x1xf32>
    %45 = math.rsqrt %44 : vector<16x1xf32>
    %46 = vector.broadcast %45 : vector<16x1xf32> to vector<16x128xf32>
    %47 = arith.mulf %37, %46 : vector<16x128xf32>
    %48 = vector.broadcast %4 : vector<1x128xf32> to vector<16x128xf32>
    %49 = arith.mulf %47, %48 : vector<16x128xf32>
    %50 = vector.broadcast %5 : vector<1x128xf32> to vector<16x128xf32>
    %51 = arith.addf %49, %50 : vector<16x128xf32>
    %c0_23 = arith.constant 0 : index
    %c0_24 = arith.constant 0 : index
    %52 = vector.load %arg6[%c0_23, %c0_24] : memref<16x128xf32, #tpu.memory_space<vmem>>, vector<16x128xf32>
    tpu.vector_store %arg6[%c0_23, %c0_24], %51 {strides = array<i32>} : memref<16x128xf32, #tpu.memory_space<vmem>>, vector<16x128xf32>,
    return
  }
  func.func @transform_0(%arg0: i32) -> (i32, i32) {
    %c0_i32 = arith.constant 0 : i32
    %c0_i32_0 = arith.constant 0 : i32
    return %arg0, %c0_i32 : i32, i32
  }
  func.func @transform_1(%arg0: i32) -> (i32, i32) {
    %c0_i32 = arith.constant 0 : i32
    %c0_i32_0 = arith.constant 0 : i32
    %c0_i32_1 = arith.constant 0 : i32
    return %c0_i32, %c0_i32_0 : i32, i32
  }
  func.func @transform_2(%arg0: i32) -> (i32, i32) {
    %c0_i32 = arith.constant 0 : i32
    %c0_i32_0 = arith.constant 0 : i32
    %c0_i32_1 = arith.constant 0 : i32
    return %c0_i32, %c0_i32_0 : i32, i32
  }
  func.func @transform_3(%arg0: i32) -> (i32, i32) {
    %c0_i32 = arith.constant 0 : i32
    %c0_i32_0 = arith.constant 0 : i32
    %c0_i32_1 = arith.constant 0 : i32
    return %c0_i32, %c0_i32_0 : i32, i32
  }
  func.func @transform_4(%arg0: i32) -> (i32, i32) {
    %c0_i32 = arith.constant 0 : i32
    %c0_i32_0 = arith.constant 0 : i32
    %c0_i32_1 = arith.constant 0 : i32
    return %c0_i32, %c0_i32_0 : i32, i32
  }
  func.func @transform_5(%arg0: i32) -> (i32, i32) {
    %c0_i32 = arith.constant 0 : i32
    %c0_i32_0 = arith.constant 0 : i32
    return %arg0, %c0_i32 : i32, i32
  }
}

module attributes {stable_mosaic.version = 11 : i64} {
  func.func @residual_mlp_kernel(%arg0: i32, %arg1: memref<16x128xbf16, #tpu.memory_space<vmem>>, %arg2: memref<128x128xbf16, #tpu.memory_space<vmem>>, %arg3: memref<128x128xbf16, #tpu.memory_space<vmem>>, %arg4: memref<128x128xbf16, #tpu.memory_space<vmem>>, %arg5: memref<8x128xf32, #tpu.memory_space<vmem>>, %arg6: memref<16x128xf32, #tpu.memory_space<vmem>>) attributes {dimension_semantics = [#tpu.dimension_semantics<parallel>], iteration_bounds = array<i64: 1>, scalar_prefetch = 0 : i64, scratch_operands = 0 : i64, tpu.core_type = #tpu.core_type<tc>, window_params = [{transform_indices = @transform_0, window_bounds = array<i64: 16, 128>}, {pipeline_mode = #tpu.pipeline_mode<synchronous>, transform_indices = @transform_1, window_bounds = array<i64: 128, 128>}, {pipeline_mode = #tpu.pipeline_mode<synchronous>, transform_indices = @transform_2, window_bounds = array<i64: 128, 128>}, {pipeline_mode = #tpu.pipeline_mode<synchronous>, transform_indices = @transform_3, window_bounds = array<i64: 128, 128>}, {pipeline_mode = #tpu.pipeline_mode<synchronous>, transform_indices = @transform_4, window_bounds = array<i64: 8, 128>}, {transform_indices = @transform_5, window_bounds = array<i64: 16, 128>}]} {
    %c0 = arith.constant 0 : index
    %c0_0 = arith.constant 0 : index
    %0 = vector.load %arg1[%c0, %c0_0] : memref<16x128xbf16, #tpu.memory_space<vmem>>, vector<16x128xbf16>
    %c0_1 = arith.constant 0 : index
    %c0_2 = arith.constant 0 : index
    %1 = vector.load %arg5[%c0_1, %c0_2] : memref<8x128xf32, #tpu.memory_space<vmem>>, vector<1x128xf32>
    %c1 = arith.constant 1 : index
    %c0_3 = arith.constant 0 : index
    %2 = vector.load %arg5[%c1, %c0_3] : memref<8x128xf32, #tpu.memory_space<vmem>>, vector<1x128xf32>
    %c2 = arith.constant 2 : index
    %c0_4 = arith.constant 0 : index
    %3 = vector.load %arg5[%c2, %c0_4] : memref<8x128xf32, #tpu.memory_space<vmem>>, vector<1x128xf32>
    %c3 = arith.constant 3 : index
    %c0_5 = arith.constant 0 : index
    %4 = vector.load %arg5[%c3, %c0_5] : memref<8x128xf32, #tpu.memory_space<vmem>>, vector<1x128xf32>
    %c4 = arith.constant 4 : index
    %c0_6 = arith.constant 0 : index
    %5 = vector.load %arg5[%c4, %c0_6] : memref<8x128xf32, #tpu.memory_space<vmem>>, vector<1x128xf32>
    %c0_7 = arith.constant 0 : index
    %c0_8 = arith.constant 0 : index
    %6 = vector.load %arg2[%c0_7, %c0_8] : memref<128x128xbf16, #tpu.memory_space<vmem>>, vector<128x128xbf16>
    %cst = arith.constant dense<0.000000e+00> : vector<16x128xf32>
    %7 = tpu.matmul %0, %6, %cst {dimension_numbers = #tpu.dot_dimension_numbers<[1], [0], [0], [1], [0, 0, 1, 1], [], []>} : vector<16x128xbf16>, vector<128x128xbf16>, vector<16x128xf32> -> vector<16x128xf32>
    %8 = vector.broadcast %1 : vector<1x128xf32> to vector<16x128xf32>
    %9 = arith.addf %7, %8 : vector<16x128xf32>
    %10 = arith.truncf %9 : vector<16x128xf32> to vector<16x128xbf16>
    %c0_9 = arith.constant 0 : index
    %c0_10 = arith.constant 0 : index
    %11 = vector.load %arg3[%c0_9, %c0_10] : memref<128x128xbf16, #tpu.memory_space<vmem>>, vector<128x128xbf16>
    %cst_11 = arith.constant dense<0.000000e+00> : vector<16x128xf32>
    %12 = tpu.matmul %10, %11, %cst_11 {dimension_numbers = #tpu.dot_dimension_numbers<[1], [0], [0], [1], [0, 0, 1, 1], [], []>} : vector<16x128xbf16>, vector<128x128xbf16>, vector<16x128xf32> -> vector<16x128xf32>
    %13 = vector.broadcast %2 : vector<1x128xf32> to vector<16x128xf32>
    %14 = arith.addf %12, %13 : vector<16x128xf32>
    %cst_12 = arith.constant 0.000000e+00 : f32
    %15 = vector.broadcast %cst_12 : f32 to vector<16x128xf32>
    %16 = arith.maximumf %14, %15 : vector<16x128xf32>
    %17 = arith.truncf %16 : vector<16x128xf32> to vector<16x128xbf16>
    %c0_13 = arith.constant 0 : index
    %c0_14 = arith.constant 0 : index
    %18 = vector.load %arg4[%c0_13, %c0_14] : memref<128x128xbf16, #tpu.memory_space<vmem>>, vector<128x128xbf16>
    %cst_15 = arith.constant dense<0.000000e+00> : vector<16x128xf32>
    %19 = tpu.matmul %17, %18, %cst_15 {dimension_numbers = #tpu.dot_dimension_numbers<[1], [0], [0], [1], [0, 0, 1, 1], [], []>} : vector<16x128xbf16>, vector<128x128xbf16>, vector<16x128xf32> -> vector<16x128xf32>
    %20 = vector.broadcast %3 : vector<1x128xf32> to vector<16x128xf32>
    %21 = arith.addf %19, %20 : vector<16x128xf32>
    %cst_16 = arith.constant 0.000000e+00 : f32
    %22 = vector.broadcast %cst_16 : f32 to vector<16x128xf32>
    %23 = arith.maximumf %21, %22 : vector<16x128xf32>
    %24 = arith.addf %23, %9 : vector<16x128xf32>
    %cst_17 = arith.constant dense<0.000000e+00> : vector<16xf32>
    %25 = vector.multi_reduction <add>, %24, %cst_17 [1] : vector<16x128xf32> to vector<16xf32>
    %26 = vector.shape_cast %25 : vector<16xf32> to vector<16x1xf32>
    %cst_18 = arith.constant 3.125000e-02 : f32
    %27 = vector.broadcast %cst_18 : f32 to vector<16x1xf32>
    %28 = arith.mulf %26, %27 : vector<16x1xf32>
    %29 = vector.broadcast %28 : vector<16x1xf32> to vector<16x128xf32>
    %30 = arith.subf %24, %29 : vector<16x128xf32>
    %31 = tpu.iota {dimensions = array<i32: 1>} : vector<1x128xi32>
    %c32_i32 = arith.constant 32 : i32
    %32 = vector.broadcast %c32_i32 : i32 to vector<1x128xi32>
    %33 = arith.cmpi slt, %31, %32 : vector<1x128xi32>
    %cst_19 = arith.constant 0.000000e+00 : f32
    %34 = vector.shape_cast %33 : vector<1x128xi1> to vector<1x128xi1>
    %35 = vector.broadcast %34 : vector<1x128xi1> to vector<16x128xi1>
    %36 = vector.broadcast %cst_19 : f32 to vector<16x128xf32>
    %37 = arith.select %35, %30, %36 : vector<16x128xi1>, vector<16x128xf32>
    %38 = arith.mulf %37, %37 : vector<16x128xf32>
    %cst_20 = arith.constant dense<0.000000e+00> : vector<16xf32>
    %39 = vector.multi_reduction <add>, %38, %cst_20 [1] : vector<16x128xf32> to vector<16xf32>
    %40 = vector.shape_cast %39 : vector<16xf32> to vector<16x1xf32>
    %cst_21 = arith.constant 3.125000e-02 : f32
    %41 = vector.broadcast %cst_21 : f32 to vector<16x1xf32>
    %42 = arith.mulf %40, %41 : vector<16x1xf32>
    %cst_22 = arith.constant 9.99999974E-6 : f32
    %43 = vector.broadcast %cst_22 : f32 to vector<16x1xf32>
    %44 = arith.addf %42, %43 : vector<16x1xf32>
    %45 = math.rsqrt %44 : vector<16x1xf32>
    %46 = vector.broadcast %45 : vector<16x1xf32> to vector<16x128xf32>
    %47 = arith.mulf %37, %46 : vector<16x128xf32>
    %48 = vector.broadcast %4 : vector<1x128xf32> to vector<16x128xf32>
    %49 = arith.mulf %47, %48 : vector<16x128xf32>
    %50 = vector.broadcast %5 : vector<1x128xf32> to vector<16x128xf32>
    %51 = arith.addf %49, %50 : vector<16x128xf32>
    %c0_23 = arith.constant 0 : index
    %c0_24 = arith.constant 0 : index
    %52 = vector.load %arg6[%c0_23, %c0_24] : memref<16x128xf32, #tpu.memory_space<vmem>>, vector<16x128xf32>
    tpu.vector_store %arg6[%c0_23, %c0_24], %51 {strides = array<i32>} : memref<16x128xf32, #tpu.memory_space<vmem>>, vector<16x128xf32>,
    return
  }
  func.func @transform_0(%arg0: i32) -> (i32, i32) {
    %c0_i32 = arith.constant 0 : i32
    %c0_i32_0 = arith.constant 0 : i32
    return %arg0, %c0_i32 : i32, i32
  }
  func.func @transform_1(%arg0: i32) -> (i32, i32) {
    %c0_i32 = arith.constant 0 : i32
    %c0_i32_0 = arith.constant 0 : i32
    %c0_i32_1 = arith.constant 0 : i32
    return %c0_i32, %c0_i32_0 : i32, i32
  }
  func.func @transform_2(%arg0: i32) -> (i32, i32) {
    %c0_i32 = arith.constant 0 : i32
    %c0_i32_0 = arith.constant 0 : i32
    %c0_i32_1 = arith.constant 0 : i32
    return %c0_i32, %c0_i32_0 : i32, i32
  }
  func.func @transform_3(%arg0: i32) -> (i32, i32) {
    %c0_i32 = arith.constant 0 : i32
    %c0_i32_0 = arith.constant 0 : i32
    %c0_i32_1 = arith.constant 0 : i32
    return %c0_i32, %c0_i32_0 : i32, i32
  }
  func.func @transform_4(%arg0: i32) -> (i32, i32) {
    %c0_i32 = arith.constant 0 : i32
    %c0_i32_0 = arith.constant 0 : i32
    %c0_i32_1 = arith.constant 0 : i32
    return %c0_i32, %c0_i32_0 : i32, i32
  }
  func.func @transform_5(%arg0: i32) -> (i32, i32) {
    %c0_i32 = arith.constant 0 : i32
    %c0_i32_0 = arith.constant 0 : i32
    return %arg0, %c0_i32 : i32, i32
  }
}

</mosaic_0001>

<bundles_post_ra>
// kernel: tpu_custom_call.1
= control target key start
LH: loop header
LB: loop body
LE: loop exit
PB: predicated region body
PF: predicated region fallthrough
CT: control target
= control target key end

     0   :  { %10 = vsyncpa [#allocation3], 0  ;;  %s886_s0 = inlined_call_operand.hbm [shape: bf16[16,128], index: 0, kind: input, shape index: {}]   ;;  %s887_s1 = inlined_call_operand.hbm [shape: bf16[128,128], index: 1, kind: input, shape index: {}]   ;;  %s888_s2 = inlined_call_operand.hbm [shape: bf16[128,128], index: 2, kind: input, shape index: {}]   ;;  %s889_s3 = inlined_call_operand.hbm [shape: bf16[128,128], index: 3, kind: input, shape index: {}]   ;;  %s890_s4 = inlined_call_operand.hbm [shape: f32[8,128], index: 4, kind: input, shape index: {}]   ;;  %s891_s5 = inlined_call_operand.hbm [shape: f32[16,128], index: 5, kind: output, shape index: {}]  }
   0x1   :  { %11 = vsyncpa [#allocation6], 0 }
   0x2   :  { %12 = vsyncpa [#allocation9], 0 }
   0x3   :  { %13 = vsyncpa [#allocation4], 0  ;;  %s784_s18 = smov [#allocation5]   ;;  %s785_s20 = smov [#allocation8]  }
   0x4   :  { %s31_s19 = sshll.u32 %s784_s18, 4  ;;  %s55_s21 = sshll.u32 %s785_s20, 4  ;;  %s32_s19 = int_to_ptr.vmem [resolvable:$true] %s31_s19  ;;  %s56_s21 = int_to_ptr.vmem [resolvable:$true] %s55_s21 }
   0x5   :  { %s664_s22 = scalar_lea.vmem %s32_s19, 1024  ;;  %p669_p1 = scmp.lt.s32.totalorder %s32_s19, %s32_s19 }
   0x6   :  { %p665_p0 = scmp.ne.s32.totalorder %s32_s19, %s664_s22  ;;  %p670_p2 = scmp.lt.s32.totalorder %s664_s22, %s664_s22 }
   0x8   :  { %p671_p3 = por %p670_p2, %p669_p1 }
   0xa   :  { %p672_p4 = pnand %p671_p3, %p665_p0 }
   0xc   :  { %675 = shalt.err (!%p672_p4)
}
   0xd   :  { %s786_s23 = smov 64   ;;  %s787_s24 = smov 4  }
   0xe   :  { %37 = dma.hbm_to_vmem [thread:$0]  %s887_s1, 1024, %s32_s19, [#allocation6], %s786_s23, %s786_s23, %s787_s24  }
   0xf   :  { %s684_s27 = scalar_lea.vmem %s56_s21, 1024  ;;  %p689_p6 = scmp.lt.s32.totalorder %s56_s21, %s56_s21 }
  0x10   :  { %p685_p5 = scmp.ne.s32.totalorder %s56_s21, %s684_s27  ;;  %p690_p7 = scmp.lt.s32.totalorder %s684_s27, %s684_s27 }
  0x12   :  { %p691_p8 = por %p690_p7, %p689_p6 }
  0x14   :  { %p692_p9 = pnand %p691_p8, %p685_p5 }
  0x16   :  { %695 = shalt.err (!%p692_p9)
}
  0x17   :  { %61 = dma.hbm_to_vmem [thread:$0]  %s889_s3, 1024, %s56_s21, [#allocation9], %s786_s23, %s786_s23, %s787_s24  }
  0x18   :  { %s788_s30 = smov [#allocation2]   ;;  %s789_s7 = smov [#allocation7]  }
  0x19   :  { %s19_s6 = sshll.u32 %s788_s30, 4  ;;  %s43_s8 = sshll.u32 %s789_s7, 4  ;;  %s20_s6 = int_to_ptr.vmem [resolvable:$true] %s19_s6  ;;  %s44_s8 = int_to_ptr.vmem [resolvable:$true] %s43_s8 }
  0x1a   :  { %s704_s1 = scalar_lea.vmem %s20_s6, 128  ;;  %p709_p11 = scmp.lt.s32.totalorder %s20_s6, %s20_s6 }
  0x1b   :  { %p705_p10 = scmp.ne.s32.totalorder %s20_s6, %s704_s1  ;;  %p710_p12 = scmp.lt.s32.totalorder %s704_s1, %s704_s1 }
  0x1d   :  { %p711_p13 = por %p710_p12, %p709_p11 }
  0x1f   :  { %p712_p0 = pnand %p711_p13, %p705_p10 }
  0x21   :  { %715 = shalt.err (!%p712_p0)
}
  0x22   :  { %25 = dma.hbm_to_vmem [thread:$0]  %s886_s0, 128, %s20_s6, [#allocation3], %s786_s23, %s786_s23, %s787_s24  }
  0x23   :  { %s724_s3 = scalar_lea.vmem %s44_s8, 1024  ;;  %p729_p2 = scmp.lt.s32.totalorder %s44_s8, %s44_s8 }
  0x24   :  { %p725_p1 = scmp.ne.s32.totalorder %s44_s8, %s724_s3  ;;  %p730_p3 = scmp.lt.s32.totalorder %s724_s3, %s724_s3 }
  0x26   :  { %p731_p4 = por %p730_p3, %p729_p2 }
  0x28   :  { %p732_p5 = pnand %p731_p4, %p725_p1 }
  0x2a   :  { %735 = shalt.err (!%p732_p5)
}
  0x2b   :  { %49 = dma.hbm_to_vmem [thread:$0]  %s888_s2, 1024, %s44_s8, [#allocation6], %s786_s23, %s786_s23, %s787_s24  }
  0x2c   :  { %s790_s13 = smov [#allocation10]  }
  0x2d   :  { %s68_s14 = sshll.u32 %s790_s13, 4  ;;  %s69_s14 = int_to_ptr.vmem [resolvable:$true] %s68_s14 }
  0x2e   :  { %s744_s15 = scalar_lea.vmem %s69_s14, 128  ;;  %p749_p7 = scmp.lt.s32.totalorder %s69_s14, %s69_s14 }
  0x2f   :  { %p745_p6 = scmp.ne.s32.totalorder %s69_s14, %s744_s15  ;;  %p750_p8 = scmp.lt.s32.totalorder %s744_s15, %s744_s15 }
  0x31   :  { %p751_p9 = por %p750_p8, %p749_p7 }
  0x33   :  { %p752_p10 = pnand %p751_p9, %p745_p6 }
  0x35   :  { %755 = shalt.err (!%p752_p10)
}
  0x36   :  { %71 = dma.hbm_to_vmem [thread:$0]  %s890_s4, 128, %s69_s14, [#allocation9]  }
  0x37   :  { %776 = dma.done.wait [#allocation3], 128  }
  0x38   :  { %777 = vsyncadd [#allocation3], 4294967168 }
  0x39   :  { %778 = dma.done.wait [#allocation6], 2048  }
  0x3a   :  { %779 = vsyncadd [#allocation6], 4294965248 }
  0x3b   :  { %780 = dma.done.wait [#allocation9], 1152  }
  0x3c   :  { %781 = vsyncadd [#allocation9], 4294966144  ;;  %v791_v0 = vmov 0.0   ;;  %vm792_vm0 = vmmov 0   ;;  %v627_v1 = vld [vmem:[#allocation5 + $0x38] sm:$0xff]   ;;  %v628_v2 = vld [vmem:[#allocation5 + $0x30] sm:$0xff]   ;;  %v444_v55 = vlaneseq }
  0x3d   :  { %555 = vmatprep.subr.bf16.mxu0 %v791_v0  ;;  %571 = vmatprep.mubr.msk.bf16.mxu0 %vm792_vm0, %v791_v0  ;;  %v629_v3 = vld [vmem:[#allocation5 + $0x28] sm:$0xff]   ;;  %v636_v4 = vld [vmem:[#allocation7 + $0x38] sm:$0xff]   ;;  %v630_v5 = vld [vmem:[#allocation5 + $0x20] sm:$0xff]   ;;  %s793_s2 = smov [#allocation11]  }
  0x3e   :  { %575 = vmatprep.subr.bf16.mxu1 %v791_v0  ;;  %591 = vmatprep.mubr.msk.bf16.mxu1 %vm792_vm0, %v791_v0  ;;  %v637_v6 = vld [vmem:[#allocation7 + $0x30] sm:$0xff]   ;;  %v631_v7 = vld [vmem:[#allocation5 + $0x18] sm:$0xff]   ;;  %v638_v8 = vld [vmem:[#allocation7 + $0x28] sm:$0xff]   ;;  %v445_v56 = vand.u32 127, %v444_v55  ;;  %s484_s4 = sshll.u32 %s793_s2, 4  ;;  %s485_s4 = int_to_ptr.vmem [resolvable:$true] %s484_s4 }
  0x3f   :  { %556 = vmatpush3.bf16.msra.mxu0 %v627_v1  ;;  %576 = vmatpush3.bf16.msra.mxu1 %v636_v4  ;;  %v632_v9 = vld [vmem:[#allocation5 + $0x10] sm:$0xff]   ;;  %v639_v10 = vld [vmem:[#allocation7 + $0x20] sm:$0xff]   ;;  %v633_v11 = vld [vmem:[#allocation5 + $0x8] sm:$0xff]   ;;  %s756_s17 = scalar_lea.vmem %s485_s4, 256  ;;  %p761_p12 = scmp.lt.s32.totalorder %s485_s4, %s485_s4 }
  0x40   :  { %557 = vmatprep.subr.bf16.mxu0 %v791_v0  ;;  %577 = vmatprep.subr.bf16.mxu1 %v791_v0  ;;  %v640_v12 = vld [vmem:[#allocation7 + $0x18] sm:$0xff]   ;;  %v634_v13 = vld [vmem:[#allocation5] sm:$0xff]   ;;  %v641_v14 = vld [vmem:[#allocation7 + $0x10] sm:$0xff]   ;;  %vm446_vm1 = vcmp.lt.s32.totalorder %v445_v56, 32  ;;  %p757_p11 = scmp.ne.s32.totalorder %s485_s4, %s756_s17  ;;  %p762_p13 = scmp.lt.s32.totalorder %s756_s17, %s756_s17 }
  0x41   :  { %v635_v15 = vld [vmem:[#allocation2] sm:$0xff]   ;;  %v642_v16 = vld [vmem:[#allocation7 + $0x8] sm:$0xff]   ;;  %v643_v17 = vld [vmem:[#allocation7] sm:$0xff]  }
  0x42   :  { %v644_v18 = vld [vmem:[#allocation8 + $0x38] sm:$0xff]   ;;  %v645_v19 = vld [vmem:[#allocation8 + $0x30] sm:$0xff]   ;;  %v646_v20 = vld [vmem:[#allocation8 + $0x28] sm:$0xff]   ;;  %p763_p0 = por %p762_p13, %p761_p12 }
  0x43   :  { %558 = vmatpush3.bf16.msra.mxu0 %v628_v2  ;;  %578 = vmatpush3.bf16.msra.mxu1 %v637_v6  ;;  %v647_v21 = vld [vmem:[#allocation8 + $0x20] sm:$0xff]   ;;  %v648_v22 = vld [vmem:[#allocation8 + $0x18] sm:$0xff]   ;;  %v649_v31 = vld [vmem:[#allocation8 + $0x10] sm:$0xff]  }
  0x44   :  { %559 = vmatprep.subr.bf16.mxu0 %v791_v0  ;;  %579 = vmatprep.subr.bf16.mxu1 %v791_v0  ;;  %v498_v24 = vld [vmem:[#allocation10] ss:$0 sm:$0xff]  ;;  %v650_v32 = vld [vmem:[#allocation8 + $0x8] sm:$0xff]   ;;  %v508_v34 = vld [vmem:[#allocation10 + $0x1] ss:$0 sm:$0xff]  ;;  %p764_p1 = pnand %p763_p0, %p757_p11 }
  0x45   :  { %v651_v33 = vld [vmem:[#allocation8] sm:$0xff]  }
  0x46   :  { %v517_v44 = vld [vmem:[#allocation10 + $0x2] ss:$0 sm:$0xff] }
  0x47   :  { %560 = vmatpush3.bf16.msra.mxu0 %v629_v3  ;;  %580 = vmatpush3.bf16.msra.mxu1 %v638_v8 }
  0x48   :  { %561 = vmatprep.subr.bf16.mxu0 %v791_v0  ;;  %581 = vmatprep.subr.bf16.mxu1 %v791_v0 }
  0x4b   :  { %562 = vmatpush3.bf16.msra.mxu0 %v630_v5  ;;  %582 = vmatpush3.bf16.msra.mxu1 %v639_v10  ;;  %v526_v10 = vld [vmem:[#allocation10 + $0x3] ss:$0 sm:$0xff] }
  0x4c   :  { %563 = vmatprep.subr.bf16.mxu0 %v791_v0  ;;  %583 = vmatprep.subr.bf16.mxu1 %v791_v0 }
  0x4f   :  { %564 = vmatpush3.bf16.msra.mxu0 %v631_v7  ;;  %584 = vmatpush3.bf16.msra.mxu1 %v640_v12  ;;  %v527_v12 = vld [vmem:[#allocation10 + $0x4] ss:$0 sm:$0xff] }
  0x50   :  { %565 = vmatprep.subr.bf16.mxu0 %v791_v0  ;;  %585 = vmatprep.subr.bf16.mxu1 %v791_v0 }
  0x53   :  { %566 = vmatpush3.bf16.msra.mxu0 %v632_v9  ;;  %586 = vmatpush3.bf16.msra.mxu1 %v641_v14 }
  0x54   :  { %567 = vmatprep.subr.bf16.mxu0 %v791_v0  ;;  %587 = vmatprep.subr.bf16.mxu1 %v791_v0 }
  0x57   :  { %568 = vmatpush3.bf16.msra.mxu0 %v633_v11  ;;  %588 = vmatpush3.bf16.msra.mxu1 %v642_v16 }
  0x58   :  { %569 = vmatprep.subr.bf16.mxu0 %v791_v0  ;;  %589 = vmatprep.subr.bf16.mxu1 %v791_v0 }
  0x5b   :  { %570 = vmatpush3.bf16.msra.mxu0 %v634_v13  ;;  %590 = vmatpush3.bf16.msra.mxu1 %v643_v17 }
  0x5c   :  { %595 = vmatprep.subr.bf16.mxu0 %v791_v0 }
  0x5e   :  { %572 = vmatmul.mubr.bf16.vlgmr.msra.gmra.mxu0 %v635_v15 }
  0x5f   :  { %611 = vmatprep.mubr.msk.bf16.mxu0 %vm792_vm0, %v791_v0  ;;  %596 = vmatpush3.bf16.msra.mxu0 %v644_v18 }
  0x60   :  { %597 = vmatprep.subr.bf16.mxu0 %v791_v0 }
  0x63   :  { %598 = vmatpush3.bf16.msra.mxu0 %v645_v19 }
  0x64   :  { %599 = vmatprep.subr.bf16.mxu0 %v791_v0 }
  0x67   :  { %600 = vmatpush3.bf16.msra.mxu0 %v646_v20 }
  0x68   :  { %601 = vmatprep.subr.bf16.mxu0 %v791_v0 }
  0x6b   :  { %602 = vmatpush3.bf16.msra.mxu0 %v647_v21 }
  0x6c   :  { %603 = vmatprep.subr.bf16.mxu0 %v791_v0 }
  0x6f   :  { %604 = vmatpush3.bf16.msra.mxu0 %v648_v22 }
  0x70   :  { %605 = vmatprep.subr.bf16.mxu0 %v791_v0 }
  0x73   :  { %606 = vmatpush3.bf16.msra.mxu0 %v649_v31 }
  0x74   :  { %607 = vmatprep.subr.bf16.mxu0 %v791_v0 }
  0x77   :  { %608 = vmatpush3.bf16.msra.mxu0 %v650_v32 }
  0x78   :  { %609 = vmatprep.subr.bf16.mxu0 %v791_v0 }
  0x7b   :  { %610 = vmatpush3.bf16.msra.mxu0 %v651_v33 }
 0x11e   :  { %v203_v23 = vpop.f32.mrf.mxu0 }
 0x11f   :  { %v204_v27 = vadd.f32 %v498_v24, %v203_v23 }
 0x120   :  { %v573_v25 = vpop.f32.mrf.mxu0 }
 0x122   :  { %v206_v26 = vpop.f32.mrf.mxu0 }
 0x123   :  { %v207_v28 = vadd.f32 %v498_v24, %v206_v26 }
 0x124   :  { %v574_v29 = vpop.f32.mrf.mxu0 }
 0x125   :  { %v210_v30 = vpack.c.bf16 %v207_v28, %v204_v27 }
 0x127   :  { %592 = vmatmul.mubr.bf16.vlgmr.msra.gmra.mxu1 %v210_v30 }
 0x1e7   :  { %v313_v35 = vpop.f32.mrf.mxu1 }
 0x1e8   :  { %v314_v37 = vadd.f32 %v508_v34, %v313_v35 }
 0x1e9   :  { %v593_v36 = vpop.f32.mrf.mxu1 }
 0x1ea   :  { %v320_v41 = vmax.f32 %v314_v37, 0.0 }
 0x1eb   :  { %v316_v38 = vpop.f32.mrf.mxu1 }
 0x1ec   :  { %v317_v39 = vadd.f32 %v508_v34, %v316_v38 }
 0x1ed   :  { %v594_v40 = vpop.f32.mrf.mxu1 }
 0x1ee   :  { %v321_v42 = vmax.f32 %v317_v39, 0.0 }
 0x1f0   :  { %v322_v43 = vpack.c.bf16 %v321_v42, %v320_v41 }
 0x1f2   :  { %612 = vmatmul.mubr.bf16.vlgmr.msra.gmra.mxu0 %v322_v43 }
 0x2b2   :  { %v425_v45 = vpop.f32.mrf.mxu0 }
 0x2b3   :  { %v426_v46 = vadd.f32 %v517_v44, %v425_v45 }
 0x2b4   :  { %v613_v47 = vpop.f32.mrf.mxu0 }
 0x2b5   :  { %v432_v48 = vmax.f32 %v426_v46, 0.0 }
 0x2b6   :  { %v428_v49 = vpop.f32.mrf.mxu0 }
 0x2b7   :  { %v429_v50 = vadd.f32 %v517_v44, %v428_v49  ;;  %v434_v51 = vadd.f32 %v432_v48, %v204_v27 }
 0x2b8   :  { %v614_v52 = vpop.f32.mrf.mxu0 }
 0x2b9   :  { %v433_v53 = vmax.f32 %v429_v50, 0.0  ;;  %436 = vadd.xlane.f32.xlu0 %v434_v51 }
 0x2bb   :  { %v435_v54 = vadd.f32 %v433_v53, %v207_v28 }
 0x2bd   :  { %438 = vadd.xlane.f32.xlu0 %v435_v54 }
 0x342   :  { %v437_v57 = vpop.xlane.xlu0 %436 }
 0x343   :  { %v440_v58 = vmul.f32 0.03125, %v437_v57 }
 0x345   :  { %v442_v59 = vsub.f32 %v434_v51, %v440_v58 }
 0x346   :  { %v439_v60 = vpop.xlane.xlu0 %438 }
 0x347   :  { %v441_v61 = vmul.f32 0.03125, %v439_v60  ;;  %v449_v62 = vsel %vm446_vm1, %v442_v59, 0.0 }
 0x348   :  { %v451_v63 = vmul.f32 %v449_v62, %v449_v62 }
 0x349   :  { %v443_v0 = vsub.f32 %v435_v54, %v441_v61 }
 0x34a   :  { %453 = vadd.xlane.f32.xlu1 %v451_v63 }
 0x34b   :  { %v450_v1 = vsel %vm446_vm1, %v443_v0, 0.0 }
 0x34c   :  { %v452_v2 = vmul.f32 %v450_v1, %v450_v1 }
 0x34e   :  { %455 = vadd.xlane.f32.xlu1 %v452_v2 }
 0x3d3   :  { %v454_v3 = vpop.xlane.xlu1 %453 }
 0x3d4   :  { %v457_v4 = vmul.f32 0.03125, %v454_v3 }
 0x3d6   :  { %v459_v5 = vadd.f32 1e-05, %v457_v4 }
 0x3d7   :  { %v456_v6 = vpop.xlane.xlu1 %455 }
 0x3d8   :  { %652 = vrsqrt.f32 %v459_v5  ;;  %v458_v7 = vmul.f32 0.03125, %v456_v6 }
 0x3da   :  { %v460_v8 = vadd.f32 1e-05, %v458_v7 }
 0x3dc   :  { %654 = vrsqrt.f32 %v460_v8 }
 0x3e5   :  { %v653_v9 = vpop.eup %652 }
 0x3e6   :  { %v463_v11 = vmul.f32 %v653_v9, %v449_v62 }
 0x3e8   :  { %v469_v13 = vmul.f32 %v526_v10, %v463_v11 }
 0x3e9   :  { %v655_v14 = vpop.eup %654 }
 0x3ea   :  { %v464_v15 = vmul.f32 %v655_v14, %v450_v1  ;;  %v475_v16 = vadd.f32 %v527_v12, %v469_v13 }
 0x3ec   :  { %v470_v17 = vmul.f32 %v526_v10, %v464_v15  ;;  %477 = vst [vmem:[#allocation11] sm:$0xff] %v475_v16 }
 0x3ee   :  { %v476_v18 = vadd.f32 %v527_v12, %v470_v17 }
 0x3f0   :  { %478 = vst [vmem:[#allocation11 + $0x8] sm:$0xff] %v476_v18 }
 0x3f1   :  { %767 = shalt.err (!%p764_p1)
}
 0x3f2   :  { %s794_s18 = smov 128   ;;  %s795_s19 = smov 8  }
 0x3f3   :  { %490 = dma.vmem_to_hbm [thread:$0]  %s485_s4, 256, %s891_s5, [#allocation4], %s794_s18, %s794_s18, %s795_s19  }
 0x3f4   :  { %782 = dma.done.wait [#allocation4], 256  }
 0x3f5   :  { %783 = vsyncadd [#allocation4], 4294967040 }
 0x3f6   :  { %494 = vsyncpa [#allocation3], 1 }
 0x3f7   :  { %495 = vsyncpa [#allocation6], 1 }
 0x3f8   :  { %496 = vsyncpa [#allocation9], 1 }
 0x3f9   :  { %497 = vsyncpa [#allocation4], 1 }

// kernel: tpu_custom_call.1
= control target key start
LH: loop header
LB: loop body
LE: loop exit
PB: predicated region body
PF: predicated region fallthrough
CT: control target
= control target key end

     0   :  { %10 = vsyncpa [#allocation3], 0  ;;  %s886_s0 = inlined_call_operand.hbm [shape: bf16[16,128], index: 0, kind: input, shape index: {}]   ;;  %s887_s1 = inlined_call_operand.hbm [shape: bf16[128,128], index: 1, kind: input, shape index: {}]   ;;  %s888_s2 = inlined_call_operand.hbm [shape: bf16[128,128], index: 2, kind: input, shape index: {}]   ;;  %s889_s3 = inlined_call_operand.hbm [shape: bf16[128,128], index: 3, kind: input, shape index: {}]   ;;  %s890_s4 = inlined_call_operand.hbm [shape: f32[8,128], index: 4, kind: input, shape index: {}]   ;;  %s891_s5 = inlined_call_operand.hbm [shape: f32[16,128], index: 5, kind: output, shape index: {}]  }
   0x1   :  { %11 = vsyncpa [#allocation6], 0 }
   0x2   :  { %12 = vsyncpa [#allocation9], 0 }
   0x3   :  { %13 = vsyncpa [#allocation4], 0  ;;  %s784_s18 = smov [#allocation5]   ;;  %s785_s20 = smov [#allocation8]  }
   0x4   :  { %s31_s19 = sshll.u32 %s784_s18, 4  ;;  %s55_s21 = sshll.u32 %s785_s20, 4  ;;  %s32_s19 = int_to_ptr.vmem [resolvable:$true] %s31_s19  ;;  %s56_s21 = int_to_ptr.vmem [resolvable:$true] %s55_s21 }
   0x5   :  { %s664_s22 = scalar_lea.vmem %s32_s19, 1024  ;;  %p669_p1 = scmp.lt.s32.totalorder %s32_s19, %s32_s19 }
   0x6   :  { %p665_p0 = scmp.ne.s32.totalorder %s32_s19, %s664_s22  ;;  %p670_p2 = scmp.lt.s32.totalorder %s664_s22, %s664_s22 }
   0x8   :  { %p671_p3 = por %p670_p2, %p669_p1 }
   0xa   :  { %p672_p4 = pnand %p671_p3, %p665_p0 }
   0xc   :  { %675 = shalt.err (!%p672_p4)
}
   0xd   :  { %s786_s23 = smov 64   ;;  %s787_s24 = smov 4  }
   0xe   :  { %37 = dma.hbm_to_vmem [thread:$0]  %s887_s1, 1024, %s32_s19, [#allocation6], %s786_s23, %s786_s23, %s787_s24  }
   0xf   :  { %s684_s27 = scalar_lea.vmem %s56_s21, 1024  ;;  %p689_p6 = scmp.lt.s32.totalorder %s56_s21, %s56_s21 }
  0x10   :  { %p685_p5 = scmp.ne.s32.totalorder %s56_s21, %s684_s27  ;;  %p690_p7 = scmp.lt.s32.totalorder %s684_s27, %s684_s27 }
  0x12   :  { %p691_p8 = por %p690_p7, %p689_p6 }
  0x14   :  { %p692_p9 = pnand %p691_p8, %p685_p5 }
  0x16   :  { %695 = shalt.err (!%p692_p9)
}
  0x17   :  { %61 = dma.hbm_to_vmem [thread:$0]  %s889_s3, 1024, %s56_s21, [#allocation9], %s786_s23, %s786_s23, %s787_s24  }
  0x18   :  { %s788_s30 = smov [#allocation2]   ;;  %s789_s7 = smov [#allocation7]  }
  0x19   :  { %s19_s6 = sshll.u32 %s788_s30, 4  ;;  %s43_s8 = sshll.u32 %s789_s7, 4  ;;  %s20_s6 = int_to_ptr.vmem [resolvable:$true] %s19_s6  ;;  %s44_s8 = int_to_ptr.vmem [resolvable:$true] %s43_s8 }
  0x1a   :  { %s704_s1 = scalar_lea.vmem %s20_s6, 128  ;;  %p709_p11 = scmp.lt.s32.totalorder %s20_s6, %s20_s6 }
  0x1b   :  { %p705_p10 = scmp.ne.s32.totalorder %s20_s6, %s704_s1  ;;  %p710_p12 = scmp.lt.s32.totalorder %s704_s1, %s704_s1 }
  0x1d   :  { %p711_p13 = por %p710_p12, %p709_p11 }
  0x1f   :  { %p712_p0 = pnand %p711_p13, %p705_p10 }
  0x21   :  { %715 = shalt.err (!%p712_p0)
}
  0x22   :  { %25 = dma.hbm_to_vmem [thread:$0]  %s886_s0, 128, %s20_s6, [#allocation3], %s786_s23, %s786_s23, %s787_s24  }
  0x23   :  { %s724_s3 = scalar_lea.vmem %s44_s8, 1024  ;;  %p729_p2 = scmp.lt.s32.totalorder %s44_s8, %s44_s8 }
  0x24   :  { %p725_p1 = scmp.ne.s32.totalorder %s44_s8, %s724_s3  ;;  %p730_p3 = scmp.lt.s32.totalorder %s724_s3, %s724_s3 }
  0x26   :  { %p731_p4 = por %p730_p3, %p729_p2 }
  0x28   :  { %p732_p5 = pnand %p731_p4, %p725_p1 }
  0x2a   :  { %735 = shalt.err (!%p732_p5)
}
  0x2b   :  { %49 = dma.hbm_to_vmem [thread:$0]  %s888_s2, 1024, %s44_s8, [#allocation6], %s786_s23, %s786_s23, %s787_s24  }
  0x2c   :  { %s790_s13 = smov [#allocation10]  }
  0x2d   :  { %s68_s14 = sshll.u32 %s790_s13, 4  ;;  %s69_s14 = int_to_ptr.vmem [resolvable:$true] %s68_s14 }
  0x2e   :  { %s744_s15 = scalar_lea.vmem %s69_s14, 128  ;;  %p749_p7 = scmp.lt.s32.totalorder %s69_s14, %s69_s14 }
  0x2f   :  { %p745_p6 = scmp.ne.s32.totalorder %s69_s14, %s744_s15  ;;  %p750_p8 = scmp.lt.s32.totalorder %s744_s15, %s744_s15 }
  0x31   :  { %p751_p9 = por %p750_p8, %p749_p7 }
  0x33   :  { %p752_p10 = pnand %p751_p9, %p745_p6 }
  0x35   :  { %755 = shalt.err (!%p752_p10)
}
  0x36   :  { %71 = dma.hbm_to_vmem [thread:$0]  %s890_s4, 128, %s69_s14, [#allocation9]  }
  0x37   :  { %776 = dma.done.wait [#allocation3], 128  }
  0x38   :  { %777 = vsyncadd [#allocation3], 4294967168 }
  0x39   :  { %778 = dma.done.wait [#allocation6], 2048  }
  0x3a   :  { %779 = vsyncadd [#allocation6], 4294965248 }
  0x3b   :  { %780 = dma.done.wait [#allocation9], 1152  }
  0x3c   :  { %781 = vsyncadd [#allocation9], 4294966144  ;;  %v791_v0 = vmov 0.0   ;;  %vm792_vm0 = vmmov 0   ;;  %v627_v1 = vld [vmem:[#allocation5 + $0x38] sm:$0xff]   ;;  %v628_v2 = vld [vmem:[#allocation5 + $0x30] sm:$0xff]   ;;  %v444_v55 = vlaneseq }
  0x3d   :  { %555 = vmatprep.subr.bf16.mxu0 %v791_v0  ;;  %571 = vmatprep.mubr.msk.bf16.mxu0 %vm792_vm0, %v791_v0  ;;  %v629_v3 = vld [vmem:[#allocation5 + $0x28] sm:$0xff]   ;;  %v636_v4 = vld [vmem:[#allocation7 + $0x38] sm:$0xff]   ;;  %v630_v5 = vld [vmem:[#allocation5 + $0x20] sm:$0xff]   ;;  %s793_s2 = smov [#allocation11]  }
  0x3e   :  { %575 = vmatprep.subr.bf16.mxu1 %v791_v0  ;;  %591 = vmatprep.mubr.msk.bf16.mxu1 %vm792_vm0, %v791_v0  ;;  %v637_v6 = vld [vmem:[#allocation7 + $0x30] sm:$0xff]   ;;  %v631_v7 = vld [vmem:[#allocation5 + $0x18] sm:$0xff]   ;;  %v638_v8 = vld [vmem:[#allocation7 + $0x28] sm:$0xff]   ;;  %v445_v56 = vand.u32 127, %v444_v55  ;;  %s484_s4 = sshll.u32 %s793_s2, 4  ;;  %s485_s4 = int_to_ptr.vmem [resolvable:$true] %s484_s4 }
  0x3f   :  { %556 = vmatpush3.bf16.msra.mxu0 %v627_v1  ;;  %576 = vmatpush3.bf16.msra.mxu1 %v636_v4  ;;  %v632_v9 = vld [vmem:[#allocation5 + $0x10] sm:$0xff]   ;;  %v639_v10 = vld [vmem:[#allocation7 + $0x20] sm:$0xff]   ;;  %v633_v11 = vld [vmem:[#allocation5 + $0x8] sm:$0xff]   ;;  %s756_s17 = scalar_lea.vmem %s485_s4, 256  ;;  %p761_p12 = scmp.lt.s32.totalorder %s485_s4, %s485_s4 }
  0x40   :  { %557 = vmatprep.subr.bf16.mxu0 %v791_v0  ;;  %577 = vmatprep.subr.bf16.mxu1 %v791_v0  ;;  %v640_v12 = vld [vmem:[#allocation7 + $0x18] sm:$0xff]   ;;  %v634_v13 = vld [vmem:[#allocation5] sm:$0xff]   ;;  %v641_v14 = vld [vmem:[#allocation7 + $0x10] sm:$0xff]   ;;  %vm446_vm1 = vcmp.lt.s32.totalorder %v445_v56, 32  ;;  %p757_p11 = scmp.ne.s32.totalorder %s485_s4, %s756_s17  ;;  %p762_p13 = scmp.lt.s32.totalorder %s756_s17, %s756_s17 }
  0x41   :  { %v635_v15 = vld [vmem:[#allocation2] sm:$0xff]   ;;  %v642_v16 = vld [vmem:[#allocation7 + $0x8] sm:$0xff]   ;;  %v643_v17 = vld [vmem:[#allocation7] sm:$0xff]  }
  0x42   :  { %v644_v18 = vld [vmem:[#allocation8 + $0x38] sm:$0xff]   ;;  %v645_v19 = vld [vmem:[#allocation8 + $0x30] sm:$0xff]   ;;  %v646_v20 = vld [vmem:[#allocation8 + $0x28] sm:$0xff]   ;;  %p763_p0 = por %p762_p13, %p761_p12 }
  0x43   :  { %558 = vmatpush3.bf16.msra.mxu0 %v628_v2  ;;  %578 = vmatpush3.bf16.msra.mxu1 %v637_v6  ;;  %v647_v21 = vld [vmem:[#allocation8 + $0x20] sm:$0xff]   ;;  %v648_v22 = vld [vmem:[#allocation8 + $0x18] sm:$0xff]   ;;  %v649_v31 = vld [vmem:[#allocation8 + $0x10] sm:$0xff]  }
  0x44   :  { %559 = vmatprep.subr.bf16.mxu0 %v791_v0  ;;  %579 = vmatprep.subr.bf16.mxu1 %v791_v0  ;;  %v498_v24 = vld [vmem:[#allocation10] ss:$0 sm:$0xff]  ;;  %v650_v32 = vld [vmem:[#allocation8 + $0x8] sm:$0xff]   ;;  %v508_v34 = vld [vmem:[#allocation10 + $0x1] ss:$0 sm:$0xff]  ;;  %p764_p1 = pnand %p763_p0, %p757_p11 }
  0x45   :  { %v651_v33 = vld [vmem:[#allocation8] sm:$0xff]  }
  0x46   :  { %v517_v44 = vld [vmem:[#allocation10 + $0x2] ss:$0 sm:$0xff] }
  0x47   :  { %560 = vmatpush3.bf16.msra.mxu0 %v629_v3  ;;  %580 = vmatpush3.bf16.msra.mxu1 %v638_v8 }
  0x48   :  { %561 = vmatprep.subr.bf16.mxu0 %v791_v0  ;;  %581 = vmatprep.subr.bf16.mxu1 %v791_v0 }
  0x4b   :  { %562 = vmatpush3.bf16.msra.mxu0 %v630_v5  ;;  %582 = vmatpush3.bf16.msra.mxu1 %v639_v10  ;;  %v526_v10 = vld [vmem:[#allocation10 + $0x3] ss:$0 sm:$0xff] }
  0x4c   :  { %563 = vmatprep.subr.bf16.mxu0 %v791_v0  ;;  %583 = vmatprep.subr.bf16.mxu1 %v791_v0 }
  0x4f   :  { %564 = vmatpush3.bf16.msra.mxu0 %v631_v7  ;;  %584 = vmatpush3.bf16.msra.mxu1 %v640_v12  ;;  %v527_v12 = vld [vmem:[#allocation10 + $0x4] ss:$0 sm:$0xff] }
  0x50   :  { %565 = vmatprep.subr.bf16.mxu0 %v791_v0  ;;  %585 = vmatprep.subr.bf16.mxu1 %v791_v0 }
  0x53   :  { %566 = vmatpush3.bf16.msra.mxu0 %v632_v9  ;;  %586 = vmatpush3.bf16.msra.mxu1 %v641_v14 }
  0x54   :  { %567 = vmatprep.subr.bf16.mxu0 %v791_v0  ;;  %587 = vmatprep.subr.bf16.mxu1 %v791_v0 }
  0x57   :  { %568 = vmatpush3.bf16.msra.mxu0 %v633_v11  ;;  %588 = vmatpush3.bf16.msra.mxu1 %v642_v16 }
  0x58   :  { %569 = vmatprep.subr.bf16.mxu0 %v791_v0  ;;  %589 = vmatprep.subr.bf16.mxu1 %v791_v0 }
  0x5b   :  { %570 = vmatpush3.bf16.msra.mxu0 %v634_v13  ;;  %590 = vmatpush3.bf16.msra.mxu1 %v643_v17 }
  0x5c   :  { %595 = vmatprep.subr.bf16.mxu0 %v791_v0 }
  0x5e   :  { %572 = vmatmul.mubr.bf16.vlgmr.msra.gmra.mxu0 %v635_v15 }
  0x5f   :  { %611 = vmatprep.mubr.msk.bf16.mxu0 %vm792_vm0, %v791_v0  ;;  %596 = vmatpush3.bf16.msra.mxu0 %v644_v18 }
  0x60   :  { %597 = vmatprep.subr.bf16.mxu0 %v791_v0 }
  0x63   :  { %598 = vmatpush3.bf16.msra.mxu0 %v645_v19 }
  0x64   :  { %599 = vmatprep.subr.bf16.mxu0 %v791_v0 }
  0x67   :  { %600 = vmatpush3.bf16.msra.mxu0 %v646_v20 }
  0x68   :  { %601 = vmatprep.subr.bf16.mxu0 %v791_v0 }
  0x6b   :  { %602 = vmatpush3.bf16.msra.mxu0 %v647_v21 }
  0x6c   :  { %603 = vmatprep.subr.bf16.mxu0 %v791_v0 }
  0x6f   :  { %604 = vmatpush3.bf16.msra.mxu0 %v648_v22 }
  0x70   :  { %605 = vmatprep.subr.bf16.mxu0 %v791_v0 }
  0x73   :  { %606 = vmatpush3.bf16.msra.mxu0 %v649_v31 }
  0x74   :  { %607 = vmatprep.subr.bf16.mxu0 %v791_v0 }
  0x77   :  { %608 = vmatpush3.bf16.msra.mxu0 %v650_v32 }
  0x78   :  { %609 = vmatprep.subr.bf16.mxu0 %v791_v0 }
  0x7b   :  { %610 = vmatpush3.bf16.msra.mxu0 %v651_v33 }
 0x11e   :  { %v203_v23 = vpop.f32.mrf.mxu0 }
 0x11f   :  { %v204_v27 = vadd.f32 %v498_v24, %v203_v23 }
 0x120   :  { %v573_v25 = vpop.f32.mrf.mxu0 }
 0x122   :  { %v206_v26 = vpop.f32.mrf.mxu0 }
 0x123   :  { %v207_v28 = vadd.f32 %v498_v24, %v206_v26 }
 0x124   :  { %v574_v29 = vpop.f32.mrf.mxu0 }
 0x125   :  { %v210_v30 = vpack.c.bf16 %v207_v28, %v204_v27 }
 0x127   :  { %592 = vmatmul.mubr.bf16.vlgmr.msra.gmra.mxu1 %v210_v30 }
 0x1e7   :  { %v313_v35 = vpop.f32.mrf.mxu1 }
 0x1e8   :  { %v314_v37 = vadd.f32 %v508_v34, %v313_v35 }
 0x1e9   :  { %v593_v36 = vpop.f32.mrf.mxu1 }
 0x1ea   :  { %v320_v41 = vmax.f32 %v314_v37, 0.0 }
 0x1eb   :  { %v316_v38 = vpop.f32.mrf.mxu1 }
 0x1ec   :  { %v317_v39 = vadd.f32 %v508_v34, %v316_v38 }
 0x1ed   :  { %v594_v40 = vpop.f32.mrf.mxu1 }
 0x1ee   :  { %v321_v42 = vmax.f32 %v317_v39, 0.0 }
 0x1f0   :  { %v322_v43 = vpack.c.bf16 %v321_v42, %v320_v41 }
 0x1f2   :  { %612 = vmatmul.mubr.bf16.vlgmr.msra.gmra.mxu0 %v322_v43 }
 0x2b2   :  { %v425_v45 = vpop.f32.mrf.mxu0 }
 0x2b3   :  { %v426_v46 = vadd.f32 %v517_v44, %v425_v45 }
 0x2b4   :  { %v613_v47 = vpop.f32.mrf.mxu0 }
 0x2b5   :  { %v432_v48 = vmax.f32 %v426_v46, 0.0 }
 0x2b6   :  { %v428_v49 = vpop.f32.mrf.mxu0 }
 0x2b7   :  { %v429_v50 = vadd.f32 %v517_v44, %v428_v49  ;;  %v434_v51 = vadd.f32 %v432_v48, %v204_v27 }
 0x2b8   :  { %v614_v52 = vpop.f32.mrf.mxu0 }
 0x2b9   :  { %v433_v53 = vmax.f32 %v429_v50, 0.0  ;;  %436 = vadd.xlane.f32.xlu0 %v434_v51 }
 0x2bb   :  { %v435_v54 = vadd.f32 %v433_v53, %v207_v28 }
 0x2bd   :  { %438 = vadd.xlane.f32.xlu0 %v435_v54 }
 0x342   :  { %v437_v57 = vpop.xlane.xlu0 %436 }
 0x343   :  { %v440_v58 = vmul.f32 0.03125, %v437_v57 }
 0x345   :  { %v442_v59 = vsub.f32 %v434_v51, %v440_v58 }
 0x346   :  { %v439_v60 = vpop.xlane.xlu0 %438 }
 0x347   :  { %v441_v61 = vmul.f32 0.03125, %v439_v60  ;;  %v449_v62 = vsel %vm446_vm1, %v442_v59, 0.0 }
 0x348   :  { %v451_v63 = vmul.f32 %v449_v62, %v449_v62 }
 0x349   :  { %v443_v0 = vsub.f32 %v435_v54, %v441_v61 }
 0x34a   :  { %453 = vadd.xlane.f32.xlu1 %v451_v63 }
 0x34b   :  { %v450_v1 = vsel %vm446_vm1, %v443_v0, 0.0 }
 0x34c   :  { %v452_v2 = vmul.f32 %v450_v1, %v450_v1 }
 0x34e   :  { %455 = vadd.xlane.f32.xlu1 %v452_v2 }
 0x3d3   :  { %v454_v3 = vpop.xlane.xlu1 %453 }
 0x3d4   :  { %v457_v4 = vmul.f32 0.03125, %v454_v3 }
 0x3d6   :  { %v459_v5 = vadd.f32 1e-05, %v457_v4 }
 0x3d7   :  { %v456_v6 = vpop.xlane.xlu1 %455 }
 0x3d8   :  { %652 = vrsqrt.f32 %v459_v5  ;;  %v458_v7 = vmul.f32 0.03125, %v456_v6 }
 0x3da   :  { %v460_v8 = vadd.f32 1e-05, %v458_v7 }
 0x3dc   :  { %654 = vrsqrt.f32 %v460_v8 }
 0x3e5   :  { %v653_v9 = vpop.eup %652 }
 0x3e6   :  { %v463_v11 = vmul.f32 %v653_v9, %v449_v62 }
 0x3e8   :  { %v469_v13 = vmul.f32 %v526_v10, %v463_v11 }
 0x3e9   :  { %v655_v14 = vpop.eup %654 }
 0x3ea   :  { %v464_v15 = vmul.f32 %v655_v14, %v450_v1  ;;  %v475_v16 = vadd.f32 %v527_v12, %v469_v13 }
 0x3ec   :  { %v470_v17 = vmul.f32 %v526_v10, %v464_v15  ;;  %477 = vst [vmem:[#allocation11] sm:$0xff] %v475_v16 }
 0x3ee   :  { %v476_v18 = vadd.f32 %v527_v12, %v470_v17 }
 0x3f0   :  { %478 = vst [vmem:[#allocation11 + $0x8] sm:$0xff] %v476_v18 }
 0x3f1   :  { %767 = shalt.err (!%p764_p1)
}
 0x3f2   :  { %s794_s18 = smov 128   ;;  %s795_s19 = smov 8  }
 0x3f3   :  { %490 = dma.vmem_to_hbm [thread:$0]  %s485_s4, 256, %s891_s5, [#allocation4], %s794_s18, %s794_s18, %s795_s19  }
 0x3f4   :  { %782 = dma.done.wait [#allocation4], 256  }
 0x3f5   :  { %783 = vsyncadd [#allocation4], 4294967040 }
 0x3f6   :  { %494 = vsyncpa [#allocation3], 1 }
 0x3f7   :  { %495 = vsyncpa [#allocation6], 1 }
 0x3f8   :  { %496 = vsyncpa [#allocation9], 1 }
 0x3f9   :  { %497 = vsyncpa [#allocation4], 1 }

</bundles_post_ra>
